<compile_context>
chip_gen: v5e
topology: v5e:2x2
jax: 0.10.0
libtpu: 0.0.40
codegen_flags: <defaults>
</compile_context>

<pallas_src>
import jax
import jax.numpy as jnp
from jax.experimental import pallas as pl
from jax.experimental.pallas import tpu as pltpu


# ----------------------------------------------------------------------------
# Kernel
# ----------------------------------------------------------------------------

def _noise_inject_kernel(w_ref, img_ref, noise_ref, out_ref):
    # w_ref:     (1,)          scalar weight (f32) in SMEM
    # img_ref:   (1, tc, ts)   image tile in VMEM, input dtype
    # noise_ref: (1, 1,  ts)   noise tile in VMEM, input dtype (broadcast over C here)
    # out_ref:   (1, tc, ts)   output tile, same dtype as the image
    w = w_ref[0]
    img = img_ref[...].astype(jnp.float32)       # upcast in-register (VPU), not in HBM
    nse = noise_ref[...].astype(jnp.float32)
    out_ref[...] = (img + w * nse).astype(out_ref.dtype)


# ----------------------------------------------------------------------------
# Tiling heuristics
# ----------------------------------------------------------------------------

_MAX_BLOCK_BYTES = 2 << 20   # ~2 MiB image block: double-buffered in+out (~8 MiB total)
                             # fits v5e's 16 MiB default scoped VMEM; ~85% of HBM roofline.
_MIN_GRID_STEPS = 4          # keep both v7x TensorCores fed (grid axes are "parallel").


def _pick_tiles(B, C, HW, itemsize,
                max_block_bytes=_MAX_BLOCK_BYTES, min_steps=_MIN_GRID_STEPS):
    """Pick (channel_tile, spatial_tile) for an image laid out as (B, C, HW)."""
    # Channel-tile candidates, largest first; splits stay multiples of 8 sublanes.
    tcs = [C]
    while tcs[-1] % 16 == 0:
        tcs.append(tcs[-1] // 2)

    # Spatial-tile candidates, largest first; must be 128-lane-multiple divisors of HW
    # (or the full ragged extent when HW is not a multiple of 128).
    if HW % 128 == 0:
        chunks = HW // 128
        tss = [d * 128 for d in range(chunks, 0, -1) if chunks % d == 0]
    else:
        tss = [HW]

    def fits(tc, ts):
        return tc * ts * itemsize <= max_block_bytes

    def steps(tc, ts):
        return B * (C // tc) * (HW // ts)

    best_fit = None
    for tc in tcs:                 # prefer full channels (noise fetched once per spatial tile)
        for ts in tss:             # prefer the biggest spatial tile that fits the byte cap
            if not fits(tc, ts):
                continue
            if best_fit is None:
                best_fit = (tc, ts)
            if steps(tc, ts) >= min_steps:
                return tc, ts
    if best_fit is not None:       # nothing reaches min_steps (tiny input): largest fitting block
        return best_fit
    if HW % 128 == 0:
        # Nothing meets the byte cap (huge, un-splittable C): smallest legal block.
        return tcs[-1], 128
    return None                    # ragged spatial axis too big: caller pads and retries


# ----------------------------------------------------------------------------
# Wrapper
# ----------------------------------------------------------------------------

def noise_injection(image, weight, noise=None, key=None):
    """image: (B, C, H, W); weight: scalar / (1,); noise: (B, 1, H, W) or None."""
    B, C, H, W = image.shape
    HW = H * W
    dtype = image.dtype
    itemsize = jnp.dtype(dtype).itemsize

    if noise is None:
        if key is None:
            key = jax.random.PRNGKey(0)
        noise = jax.random.normal(key, (B, 1, H, W), dtype)

    img = image.reshape(B, C, HW)                  # keep the input dtype on the wire
    nse = noise.reshape(B, 1, HW).astype(dtype)
    w = jnp.asarray(weight, jnp.float32).reshape(1)

    tiles = _pick_tiles(B, C, HW, itemsize)
    hw_p = HW
    if tiles is None:
        # Ragged lane axis (HW % 128 != 0) too large for a single block even with channel
        # tiling: pad the spatial axis once so it becomes tileable, slice the output back.
        hw_p = ((HW + 127) // 128) * 128
        img = jnp.pad(img, ((0, 0), (0, 0), (0, hw_p - HW)))
        nse = jnp.pad(nse, ((0, 0), (0, 0), (0, hw_p - HW)))
        tiles = _pick_tiles(B, C, hw_p, itemsize)
    tc, ts = tiles

    grid = (B, C // tc, hw_p // ts)

    out = pl.pallas_call(
        _noise_inject_kernel,
        out_shape=jax.ShapeDtypeStruct((B, C, hw_p), dtype),
        grid=grid,
        in_specs=[
            pl.BlockSpec(memory_space=pltpu.MemorySpace.SMEM),          # scalar weight
            pl.BlockSpec((1, tc, ts), lambda b, ci, si: (b, ci, si)),   # image tile
            pl.BlockSpec((1, 1, ts), lambda b, ci, si: (b, 0, si)),     # noise tile (bcast C)
        ],
        out_specs=pl.BlockSpec((1, tc, ts), lambda b, ci, si: (b, ci, si)),
        compiler_params=pltpu.CompilerParams(
            dimension_semantics=("parallel", "parallel", "parallel"),
        ),
    )(w, img, nse)

    if hw_p != HW:
        out = out[:, :, :HW]
    return out.reshape(B, C, H, W)


# ----------------------------------------------------------------------------
# Driver
# ----------------------------------------------------------------------------

if __name__ == "__main__":
    key = jax.random.PRNGKey(0)
    k_img, k_noise, k_gen, k_img2 = jax.random.split(key, 4)

    B, C, H, W = 2, 4, 16, 16
    image = jax.random.normal(k_img, (B, C, H, W), jnp.float32)

    # 1) Module at init (weight == 0), noise drawn internally -> output == image (same dtype).
    w0 = jnp.zeros((1,), jnp.float32)
    out0 = jax.block_until_ready(noise_injection(image, w0, noise=None, key=k_gen))
    assert out0.shape == (B, C, H, W) and out0.dtype == image.dtype
    assert bool(jnp.allclose(out0, image, atol=1e-6, rtol=1e-6))

    # 2) Nonzero weight, explicit noise (f32) -> pure-JAX reference.
    w1 = jnp.asarray([0.37], jnp.float32)
    noise = jax.random.normal(k_noise, (B, 1, H, W), jnp.float32)
    out1 = jax.block_until_ready(noise_injection(image, w1, noise=noise))
    ref1 = image + w1[0] * noise                        # broadcasts over the channel dim
    assert out1.shape == (B, C, H, W)
    assert bool(jnp.all(jnp.isfinite(out1)))
    assert bool(jnp.allclose(out1, ref1, atol=1e-5, rtol=1e-5))

    # 3) bf16 I/O path: bf16 on the wire, f32 math in-register, bf16 result.
    image_bf = image.astype(jnp.bfloat16)
    noise_bf = noise.astype(jnp.bfloat16)
    out_bf = jax.block_until_ready(noise_injection(image_bf, w1, noise=noise_bf))
    ref_bf = (image_bf.astype(jnp.float32) + w1[0] * noise_bf.astype(jnp.float32))
    assert out_bf.dtype == jnp.bfloat16
    assert bool(jnp.allclose(out_bf.astype(jnp.float32), ref_bf, atol=2e-2, rtol=2e-2))

    # 4) Ragged spatial size (H*W not a multiple of 128) exercises the full-extent block path.
    Hr = Wr = 10
    image_r = jax.random.normal(k_img2, (B, C, Hr, Wr), jnp.float32)
    noise_r = jax.random.normal(k_noise, (B, 1, Hr, Wr), jnp.float32)
    out_r = jax.block_until_ready(noise_injection(image_r, w1, noise=noise_r))
    ref_r = image_r + w1[0] * noise_r
    assert bool(jnp.allclose(out_r, ref_r, atol=1e-5, rtol=1e-5))

    print("KERNEL_OK")
</pallas_src>

<mosaic_0001>
module attributes {stable_mosaic.version = 11 : i64} {
  func.func @_noise_inject_kernel(%arg0: i32, %arg1: i32, %arg2: i32, %arg3: memref<1xf32, #tpu.memory_space<smem>>, %arg4: memref<1x4x128xf32, #tpu.memory_space<vmem>>, %arg5: memref<1x1x128xf32, #tpu.memory_space<vmem>>, %arg6: memref<1x4x128xf32, #tpu.memory_space<vmem>>) attributes {dimension_semantics = [#tpu.dimension_semantics<parallel>, #tpu.dimension_semantics<parallel>, #tpu.dimension_semantics<parallel>], iteration_bounds = array<i64: 2, 1, 2>, scalar_prefetch = 0 : i64, scratch_operands = 0 : i64, tpu.core_type = #tpu.core_type<tc>, window_params = [{transform_indices = @transform_0, window_bounds = array<i64: 1>}, {transform_indices = @transform_1, window_bounds = array<i64: 1, 4, 128>}, {transform_indices = @transform_2, window_bounds = array<i64: 1, 1, 128>}, {transform_indices = @transform_3, window_bounds = array<i64: 1, 4, 128>}]} {
    %c0 = arith.constant 0 : index
    %0 = memref.load %arg3[%c0] : memref<1xf32, #tpu.memory_space<smem>>
    %c0_0 = arith.constant 0 : index
    %c0_1 = arith.constant 0 : index
    %c0_2 = arith.constant 0 : index
    %1 = vector.load %arg4[%c0_0, %c0_1, %c0_2] : memref<1x4x128xf32, #tpu.memory_space<vmem>>, vector<1x4x128xf32>
    %c0_3 = arith.constant 0 : index
    %c0_4 = arith.constant 0 : index
    %c0_5 = arith.constant 0 : index
    %2 = vector.load %arg5[%c0_3, %c0_4, %c0_5] : memref<1x1x128xf32, #tpu.memory_space<vmem>>, vector<1x1x128xf32>
    %3 = vector.broadcast %0 : f32 to vector<1x1x128xf32>
    %4 = arith.mulf %3, %2 : vector<1x1x128xf32>
    %5 = vector.broadcast %4 : vector<1x1x128xf32> to vector<1x4x128xf32>
    %6 = arith.addf %1, %5 : vector<1x4x128xf32>
    %c0_6 = arith.constant 0 : index
    %c0_7 = arith.constant 0 : index
    %c0_8 = arith.constant 0 : index
    %7 = vector.load %arg6[%c0_6, %c0_7, %c0_8] : memref<1x4x128xf32, #tpu.memory_space<vmem>>, vector<1x4x128xf32>
    tpu.vector_store %arg6[%c0_6, %c0_7, %c0_8], %6 {strides = array<i32>} : memref<1x4x128xf32, #tpu.memory_space<vmem>>, vector<1x4x128xf32>,
    return
  }
  func.func @transform_0(%arg0: i32, %arg1: i32, %arg2: i32) -> i32 {
    %c0_i32 = arith.constant 0 : i32
    %c0_i32_0 = arith.constant 0 : i32
    return %c0_i32 : i32
  }
  func.func @transform_1(%arg0: i32, %arg1: i32, %arg2: i32) -> (i32, i32, i32) {
    %c0_i32 = arith.constant 0 : i32
    return %arg0, %arg1, %arg2 : i32, i32, i32
  }
  func.func @transform_2(%arg0: i32, %arg1: i32, %arg2: i32) -> (i32, i32, i32) {
    %c0_i32 = arith.constant 0 : i32
    %c0_i32_0 = arith.constant 0 : i32
    return %arg0, %c0_i32, %arg2 : i32, i32, i32
  }
  func.func @transform_3(%arg0: i32, %arg1: i32, %arg2: i32) -> (i32, i32, i32) {
    %c0_i32 = arith.constant 0 : i32
    return %arg0, %arg1, %arg2 : i32, i32, i32
  }
}

</mosaic_0001>

<bundles_post_ra>
// kernel: tpu_custom_call.1
= control target key start
LH: loop header
LB: loop body
LE: loop exit
PB: predicated region body
PF: predicated region fallthrough
CT: control target
= control target key end

     0   :  { %s847_s0 = inlined_call_operand.<no memory space> [shape: f32[1], index: 0, kind: input, shape index: {}]   ;;  %s848_s1 = inlined_call_operand.hbm [shape: f32[2,4,256], index: 1, kind: input, shape index: {}]   ;;  %s849_s2 = inlined_call_operand.hbm [shape: f32[2,1,256], index: 2, kind: input, shape index: {}]   ;;  %s850_s3 = inlined_call_operand.hbm [shape: f32[2,4,256], index: 3, kind: output, shape index: {}]  }
   0x1   :  { %8 = sst [smem:[#allocation2]] %s847_s0 }
   0x2   :  { %9 = vsyncpa [#allocation4], 0 }
   0x3   :  { %11 = vsyncpa [#allocation4 + $0x1], 0 }
   0x4   :  { %12 = vsyncpa [#allocation7], 0 }
   0x5   :  { %14 = vsyncpa [#allocation7 + $0x1], 0 }
   0x6   :  { %15 = vsyncpa [#allocation5], 0 }
   0x7   :  { %17 = vsyncpa [#allocation5 + $0x1], 0  ;;  %s688_s14 = smov 0   ;;  %s690_s15 = smov 0  }
   0x8   :  { %s692_s16 = smov 0   ;;  %s694_s17 = smov 0  }
   0x9   :  { %s696_s18 = smov 0   ;;  %s698_s19 = smov 0  }
   0xa   :  { %s700_s20 = smov 0   ;;  %s702_s0 = smov 0  }
   0xb LB: > { %s402_s21 = sadd.s32 4294967295, %s663_s0   ;;  %s403_s22 = sadd.s32 4294967294, %s663_s0   ;;  %s663_s0 = sphi %s702_s0, %s23_s0   ;;  %s659_s20 = sphi %s700_s20, %s862_s20   ;;  %s655_s19 = sphi %s698_s19, %s861_s19   ;;  %s651_s18 = sphi %s696_s18, %s860_s18   ;;  %s647_s17 = sphi %s694_s17, %s859_s17   ;;  %s643_s16 = sphi %s692_s16, %s858_s16   ;;  %s639_s15 = sphi %s690_s15, %s857_s15   ;;  %s635_s14 = sphi %s688_s14, %s856_s14  }
   0xc   : > { %s35_s23 = sadd.s32 1, %s655_s19  ;;  %s42_s24 = sadd.s32 1, %s659_s20 }
   0xd   : > { %p36_p0 = scmp.ge.s32.totalorder %s35_s23, 2  ;;  %s74_s25 = sadd.s32 1, %s643_s16 }
   0xe   : > { %p81_p1 = scmp.ne.s32.totalorder %s643_s16, %s639_s15  ;;  %p82_p2 = scmp.eq.s32.totalorder %s663_s0, 0 }
   0xf   : > { %s864_s23 = smov (%p36_p0, %s35_s23), 0  ;;  %s866_s24 = smov (!%p36_p0, %s42_s24), %s659_s20 }
  0x10   : > { %s70_s26 = ssub.s32 %s655_s19, %s864_s23  ;;  %p741_p3 = por %p82_p2, %p81_p1 }
  0x11   : > { %p44_p4 = scmp.ge.s32.totalorder %s866_s24, 2  ;;  %p87_p5 = scmp.ne.s32.totalorder %s639_s15, %s635_s14 }
  0x12   : > { %p88_p6 = scmp.eq.s32.totalorder %s402_s21, 0  ;;  %p143_p7 = scmp.eq.s32.totalorder %s402_s21, 3 }
  0x13   : > { %s868_s24 = smov (%p44_p4, %s866_s24), 0  ;;  %p149_p10 = scmp.eq.s32.totalorder %s403_s22, 3 }
  0x14   : > { %p749_p8 = por %p88_p6, %p87_p5  ;;  %p753_p9 = por %p143_p7, %p81_p1 }
  0x15   : > { %s67_s30 = ssub.s32 %s659_s20, %s868_s24  ;;  %p759_p12 = por %p149_p10, %p87_p5 }
  0x16   : > { %s71_s4 = sor.u32 %s70_s26, %s67_s30  ;;  %p435_p13 = scmp.lt.s32.totalorder %s663_s0, 4 }
  0x17   : > { %p72_p11 = scmp.eq.s32.totalorder %s71_s4, 0  ;;  %s172_s6 = sand.u32 1, %s643_s16  }
  0x18   : > { %s406_s8 = sshll.u32 %s172_s6, 2  ;;  %s407_s9 = sshll.u32 %s659_s20, 1 }
  0x19   : > { %s766_s7 = scalar_select %p72_p11, %s643_s16, %s74_s25  }
  0x1a   : > { %s182_s10 = sadd.s32 %s655_s19, %s407_s9  ;;  %s176_s11 = scalar_lea.vmem [#allocation3], %s406_s8 }
  0x1b   : > { %s188_s12 = sshll.u32 %s176_s11, 4  ;;  %s408_s13 = sshll.u32 %s182_s10, 2  ;;  %s189_s12 = int_to_ptr.vmem [resolvable:$true] %s188_s12 }
  0x1c   : > { %s184_s26 = scalar_lea.hbm %s848_s1, %s408_s13  ;;  %p775_p0 = pnand %p435_p13, %p741_p3 }
  0x1d   : > { %s186_s25 = sshll.u32 %s184_s26, 4  ;;  %p410_p1 = scmp.ge.s32.totalorder %s663_s0, 1  ;;  %s187_s25 = int_to_ptr.hbm [resolvable:$true] %s186_s25 }
  0x1e   : > { %s173_s4 = scalar_lea.sflag [#allocation4], %s172_s6  ;;  %p212_p2 = scmp.lt.s32.totalorder %s663_s0, 5 }
  0x1f   : > { %427 = dma.hbm_to_vmem [thread:$0]  (!%p775_p0), %s187_s25, 64, %s189_s12, %s173_s4  }
  0x20   : > { %s203_s11 = scalar_lea.hbm %s849_s2, %s182_s10  ;;  %p213_p4 = pnand %p410_p1, %p212_p2 }
  0x21   : > { %s205_s13 = sshll.u32 %s203_s11, 4  ;;  %s198_s27 = scalar_lea.vmem [#allocation6], %s172_s6  ;;  %s206_s13 = int_to_ptr.hbm [resolvable:$true] %s205_s13 }
  0x22   : > { %s207_s21 = sshll.u32 %s198_s27, 4  ;;  %s196_s22 = scalar_lea.sflag [#allocation7], %s172_s6  ;;  %s208_s21 = int_to_ptr.vmem [resolvable:$true] %s207_s21 }
  0x23   : > { %430 = dma.hbm_to_vmem [thread:$0]  (!%p775_p0), %s206_s13, 16, %s208_s21, %s196_s22  }
  0x24   : > { %216 = sbr.rel (%p213_p4) target bundleno = 61 (0x3d), region = 32  ;;  %s789_s26 = sand.u32 (!%p213_p4), 1, %s639_s15  }
  0x25   : > { %s411_s12 = sshll.u32 (!%p213_p4), %s789_s26, 2  ;;  %s219_s25 = scalar_lea.sflag (!%p213_p4), [#allocation4], %s789_s26 }
  0x26   : > { %s222_s4 = scalar_lea.vmem (!%p213_p4), [#allocation3], %s411_s12 }
  0x29   : > { %622 = dma.done.wait (%p749_p8), %s219_s25, 64  }
  0x2a   : > { %624 = vsyncadd (%p749_p8), %s219_s25, 4294967232  ;;  %s229_s6 = scalar_lea.sflag [#allocation7], %s789_s26  ;;  %s231_s10 = scalar_lea.vmem [#allocation6], %s789_s26 }
  0x2b   : > { %626 = dma.done.wait (%p749_p8), %s229_s6, 16  }
  0x2c   : > { %628 = vsyncadd (%p749_p8), %s229_s6, 4294967280  ;;  %s259_s30 = sld [smem:[#allocation2]]  ;;  %s414_s8 = sshll.u32 %s651_s18, 1  ;;  %v261_v1 = vld [vmem:[%s231_s10] sm:$0x1] }
  0x2d   : > { %s282_s9 = sadd.s32 %s647_s17, %s414_s8  ;;  %v260_v3 = vld [vmem:[%s222_s4] sm:$0xf]  ;;  %s258_s22 = scalar_lea.vmem [#allocation8], %s411_s12 }
  0x2e   : > { %s415_s11 = sshll.u32 %s282_s9, 2  ;;  %s286_s25 = sshll.u32 %s258_s22, 4  ;;  %s287_s25 = int_to_ptr.vmem [resolvable:$true] %s286_s25 }
  0x2f   : > { %s284_s21 = scalar_lea.hbm %s850_s3, %s415_s11  ;;  %s270_s18 = scalar_lea.sflag [#allocation5], %s789_s26 }
  0x30   : > { %s288_s28 = sshll.u32 %s284_s21, 4  ;;  %s581_s4 = scalar_lea.hbm %s850_s3, 16  ;;  %s289_s28 = int_to_ptr.hbm [resolvable:$true] %s288_s28 }
  0x31   : > { %s575_s17 = sshra.s32 %s289_s28, 4  ;;  %s576_s17 = int_to_ptr.hbm [resolvable:$true] %s575_s17 }
  0x32   : > { %v262_v0 = vstv %s259_s30  ;;  %s577_s6 = scalar_lea.hbm %s576_s17, 4  ;;  %p582_p7 = scmp.lt.s32.totalorder %s576_s17, %s850_s3 }
  0x33   : > { %v263_v2 = vmul.f32 %v262_v0, %v261_v1  ;;  %p578_p3 = scmp.ne.s32.totalorder %s576_s17, %s577_s6  ;;  %p583_p8 = scmp.lt.s32.totalorder %s581_s4, %s577_s6 }
  0x35   : > { %v265_v4 = vperm.slane %v263_v2, 0  ;;  %p579_p5 = pnand %p578_p3, %p753_p9  ;;  %p584_p10 = por %p583_p8, %p582_p7 }
  0x37   : > { %v267_v5 = vadd.f32 %v265_v4, %v260_v3  ;;  %p580_p6 = pneg %p579_p5 }
  0x39   : > { %268 = vst [vmem:[%s258_s22] sm:$0xf] %v267_v5  ;;  %p585_p11 = pnand %p584_p10, %p580_p6 }
  0x3b   : > { %588 = shalt.err (!%p585_p11)
}
  0x3c   : > { %422 = dma.vmem_to_hbm [thread:$0]  (%p753_p9), %s287_s25, 64, %s289_s28, %s270_s18  }
  0x3d PF: > { %p436_p13 = scmp.ge.s32.totalorder %s663_s0, 2  ;;  %s300_s26 = sand.u32 1, %s635_s14  }
  0x3e   : > { %s301_s9 = scalar_lea.sflag [#allocation5], %s300_s26 }
  0x3f   : > { %p432_p0 = pnand %p436_p13, %p759_p12 }
  0x41   : > { %p433_p1 = pneg %p432_p0 }
  0x43   : > { %630 = dma.done.wait (%p433_p1), %s301_s9, 64  }
  0x44   : > { %632 = vsyncadd (%p433_p1), %s301_s9, 4294967232  ;;  %s23_s0 = sadd.s32 1, %s663_s0   ;;  %s856_s14 = smov %s639_s15 }
  0x45   : > { %p20_p2 = scmp.ge.s32.totalorder %s23_s0, 6   ;;  %s857_s15 = smov %s643_s16 }
  0x46   : > { %s858_s16 = smov %s766_s7  ;;  %s859_s17 = smov %s655_s19 }
  0x47   : > { %s860_s18 = smov %s659_s20  ;;  %s861_s19 = smov %s864_s23 }
  0x48   : > { %s862_s20 = smov %s868_s24  ;;  %22 = sbr.rel (!%p20_p2) target bundleno = 11 (0xb), region = 90 }
  0x4d   :  { %307 = vsyncpa [#allocation4], 1 }
  0x4e   :  { %309 = vsyncpa [#allocation4 + $0x1], 1 }
  0x4f   :  { %310 = vsyncpa [#allocation7], 1 }
  0x50   :  { %312 = vsyncpa [#allocation7 + $0x1], 1 }
  0x51   :  { %313 = vsyncpa [#allocation5], 1 }
  0x52   :  { %315 = vsyncpa [#allocation5 + $0x1], 1 }

</bundles_post_ra>
